<compile_context>
chip_gen: v7x
topology: tpu7x:2x2x1
jax: 0.10.0
libtpu: 0.0.40
codegen_flags: <defaults>
</compile_context>

<pallas_src>
import functools

import jax
import jax.numpy as jnp
from jax.experimental import pallas as pl
from jax.experimental.pallas import tpu as pltpu


# ----------------------------------------------------------------------------
# Kernel
# ----------------------------------------------------------------------------
def _critic_kernel(s_ref, a_ref,
                   w1s, w1a, b1,      # fused layer 1 (rows split over state/action)
                   w2, b2,            # fused layer 2 (block-diagonal)
                   w3, b3,            # fused heads: (2H, 2)
                   q_ref):
    """Computes both Q heads for one batch tile entirely in VMEM."""
    # Layer 1: relu(state @ W1s + action @ W1a + b1)  -> (tb, 2H)
    h = jnp.dot(s_ref[...], w1s[...], preferred_element_type=jnp.float32)
    h = h + jnp.dot(a_ref[...], w1a[...], preferred_element_type=jnp.float32)
    h = jnp.maximum(h + b1[...], 0.0)

    # Layer 2: relu(h @ blockdiag(W2, W5) + b2)       -> (tb, 2H)
    h = jnp.dot(h, w2[...], preferred_element_type=jnp.float32) + b2[...]
    h = jnp.maximum(h, 0.0)

    # Heads: h @ [[w3, 0], [0, w6]] + [b3, b6]        -> (tb, 2)
    q_ref[...] = jnp.dot(h, w3[...], preferred_element_type=jnp.float32) + b3[...]


# ----------------------------------------------------------------------------
# Wrapper
# ----------------------------------------------------------------------------
def _pick_batch_tile(B, batch_tile):
    if batch_tile is not None:
        return min(batch_tile, B)
    if B <= 8:
        return B
    # Aim for >= 2 grid steps (keeps both v7x TensorCores busy); cap the tile
    # at 512 rows; round up to a sublane multiple of 8.
    half = -(-B // 2)
    half = -(-half // 8) * 8
    return min(512, half)


@functools.partial(jax.jit, static_argnames=("batch_tile",))
def critic_forward(state, action, packed, batch_tile=None):
    """Pallas-backed equivalent of Critic.forward(state, action) -> (q1, q2)."""
    state = state.astype(jnp.float32)
    action = action.astype(jnp.float32)
    B, Ds = state.shape
    Da = action.shape[1]
    H2 = packed["w1s"].shape[1]          # 2 * hidden_dimension

    tb = _pick_batch_tile(B, batch_tile)
    grid = (pl.cdiv(B, tb),)

    # Weights / biases: whole array resident, same block every grid step
    # (constant index_map -> Pallas skips re-fetching them between steps).
    def full_spec(shape):
        return pl.BlockSpec(shape, lambda i: (0, 0))

    in_specs = [
        pl.BlockSpec((tb, Ds), lambda i: (i, 0)),   # state batch tile
        pl.BlockSpec((tb, Da), lambda i: (i, 0)),   # action batch tile
        full_spec((Ds, H2)), full_spec((Da, H2)), full_spec((1, H2)),   # layer 1
        full_spec((H2, H2)), full_spec((1, H2)),                        # layer 2
        full_spec((H2, 2)),  full_spec((1, 2)),                         # heads
    ]
    out_specs = pl.BlockSpec((tb, 2), lambda i: (i, 0))

    q = pl.pallas_call(
        _critic_kernel,
        out_shape=jax.ShapeDtypeStruct((B, 2), jnp.float32),
        grid_spec=pltpu.PrefetchScalarGridSpec(
            num_scalar_prefetch=0,
            grid=grid,
            in_specs=in_specs,
            out_specs=out_specs,
        ),
        compiler_params=pltpu.CompilerParams(
            dimension_semantics=("parallel",)),
    )(state, action,
      packed["w1s"], packed["w1a"], packed["b1"],
      packed["w2"], packed["b2"],
      packed["w3"], packed["b3"])

    return q[:, 0:1], q[:, 1:2]


# ----------------------------------------------------------------------------
# Parameter init / packing
# ----------------------------------------------------------------------------
def init_critic_params(key, state_dim, action_dim, hidden_dimension):
    """Deterministic init matching nn.Linear shapes (PyTorch-style uniform).
    Weights are stored transposed: (in_features, out_features)."""
    D = state_dim + action_dim
    H = hidden_dimension
    layer_dims = [(D, H), (H, H), (H, 1), (D, H), (H, H), (H, 1)]
    params = {}
    keys = jax.random.split(key, 2 * len(layer_dims))
    for idx, (fan_in, fan_out) in enumerate(layer_dims):
        bound = 1.0 / jnp.sqrt(jnp.float32(fan_in))
        wk, bk = keys[2 * idx], keys[2 * idx + 1]
        params[f"w{idx + 1}"] = jax.random.uniform(
            wk, (fan_in, fan_out), jnp.float32, -bound, bound)
        params[f"b{idx + 1}"] = jax.random.uniform(
            bk, (1, fan_out), jnp.float32, -bound, bound)
    return params


def pack_critic_params(params, state_dim):
    """One-time packing of the six Linear layers into fused twin-head arrays."""
    H = params["w1"].shape[1]

    # Layer 1: concat heads along output dim, split rows over state/action.
    w1 = jnp.concatenate([params["w1"], params["w4"]], axis=1)        # (D, 2H)
    w1s, w1a = w1[:state_dim], w1[state_dim:]
    b1 = jnp.concatenate([params["b1"], params["b4"]], axis=1)        # (1, 2H)

    # Layer 2: block-diagonal so the two heads stay independent.
    w2 = jnp.zeros((2 * H, 2 * H), jnp.float32)
    w2 = w2.at[:H, :H].set(params["w2"]).at[H:, H:].set(params["w5"])  # (2H, 2H)
    b2 = jnp.concatenate([params["b2"], params["b5"]], axis=1)         # (1, 2H)

    # Heads: one (2H, 2) matmul instead of two N=1 matmuls.
    w3 = jnp.zeros((2 * H, 2), jnp.float32)
    w3 = w3.at[:H, 0:1].set(params["w3"]).at[H:, 1:2].set(params["w6"])  # (2H, 2)
    b3 = jnp.concatenate([params["b3"], params["b6"]], axis=1)           # (1, 2)

    return {"w1s": w1s, "w1a": w1a, "b1": b1,
            "w2": w2, "b2": b2, "w3": w3, "b3": b3}


# ----------------------------------------------------------------------------
# Reference (pure JAX, unpacked params) for correctness checking
# ----------------------------------------------------------------------------
def _reference_forward(state, action, params):
    sa = jnp.concatenate([state, action], axis=1)
    h = jax.nn.relu(sa @ params["w1"] + params["b1"])
    h = jax.nn.relu(h @ params["w2"] + params["b2"])
    q1 = h @ params["w3"] + params["b3"]
    g = jax.nn.relu(sa @ params["w4"] + params["b4"])
    g = jax.nn.relu(g @ params["w5"] + params["b5"])
    q2 = g @ params["w6"] + params["b6"]
    return q1, q2


if __name__ == "__main__":
    state_dim, action_dim, hidden = 12, 4, 32
    batch = 8

    key = jax.random.PRNGKey(0)
    kp, ks, ka = jax.random.split(key, 3)
    params = init_critic_params(kp, state_dim, action_dim, hidden)
    packed = pack_critic_params(params, state_dim)

    state = jax.random.normal(ks, (batch, state_dim), jnp.float32)
    action = jax.random.normal(ka, (batch, action_dim), jnp.float32)

    q1, q2 = critic_forward(state, action, packed)
    jax.block_until_ready((q1, q2))

    # sanity check against pure-JAX reference built from the unpacked params
    r1, r2 = _reference_forward(state, action, params)
    assert q1.shape == (batch, 1) and q2.shape == (batch, 1)
    assert jnp.allclose(q1, r1, atol=1e-5), "q1 mismatch"
    assert jnp.allclose(q2, r2, atol=1e-5), "q2 mismatch"

    print("KERNEL_OK")
</pallas_src>

<mosaic_0001>
module attributes {stable_mosaic.version = 11 : i64} {
  func.func @_critic_kernel(%arg0: i32, %arg1: memref<8x12xf32, #tpu.memory_space<vmem>>, %arg2: memref<8x4xf32, #tpu.memory_space<vmem>>, %arg3: memref<12x64xf32, #tpu.memory_space<vmem>>, %arg4: memref<4x64xf32, #tpu.memory_space<vmem>>, %arg5: memref<1x64xf32, #tpu.memory_space<vmem>>, %arg6: memref<64x64xf32, #tpu.memory_space<vmem>>, %arg7: memref<1x64xf32, #tpu.memory_space<vmem>>, %arg8: memref<64x2xf32, #tpu.memory_space<vmem>>, %arg9: memref<1x2xf32, #tpu.memory_space<vmem>>, %arg10: memref<8x2xf32, #tpu.memory_space<vmem>>) attributes {dimension_semantics = [#tpu.dimension_semantics<parallel>], iteration_bounds = array<i64: 1>, scalar_prefetch = 0 : i64, scratch_operands = 0 : i64, tpu.core_type = #tpu.core_type<tc>, window_params = [{transform_indices = @transform_0, window_bounds = array<i64: 8, 12>}, {transform_indices = @transform_1, window_bounds = array<i64: 8, 4>}, {pipeline_mode = #tpu.pipeline_mode<synchronous>, transform_indices = @transform_2, window_bounds = array<i64: 12, 64>}, {pipeline_mode = #tpu.pipeline_mode<synchronous>, transform_indices = @transform_3, window_bounds = array<i64: 4, 64>}, {pipeline_mode = #tpu.pipeline_mode<synchronous>, transform_indices = @transform_4, window_bounds = array<i64: 1, 64>}, {pipeline_mode = #tpu.pipeline_mode<synchronous>, transform_indices = @transform_5, window_bounds = array<i64: 64, 64>}, {pipeline_mode = #tpu.pipeline_mode<synchronous>, transform_indices = @transform_6, window_bounds = array<i64: 1, 64>}, {pipeline_mode = #tpu.pipeline_mode<synchronous>, transform_indices = @transform_7, window_bounds = array<i64: 64, 2>}, {pipeline_mode = #tpu.pipeline_mode<synchronous>, transform_indices = @transform_8, window_bounds = array<i64: 1, 2>}, {transform_indices = @transform_9, window_bounds = array<i64: 8, 2>}]} {
    %c0 = arith.constant 0 : index
    %c0_0 = arith.constant 0 : index
    %0 = vector.load %arg1[%c0, %c0_0] : memref<8x12xf32, #tpu.memory_space<vmem>>, vector<8x12xf32>
    %c0_1 = arith.constant 0 : index
    %c0_2 = arith.constant 0 : index
    %1 = vector.load %arg3[%c0_1, %c0_2] : memref<12x64xf32, #tpu.memory_space<vmem>>, vector<12x64xf32>
    %cst = arith.constant dense<0.000000e+00> : vector<8x64xf32>
    %2 = tpu.matmul %0, %1, %cst {dimension_numbers = #tpu.dot_dimension_numbers<[1], [0], [0], [1], [0, 0, 1, 1], [], []>} : vector<8x12xf32>, vector<12x64xf32>, vector<8x64xf32> -> vector<8x64xf32>
    %c0_3 = arith.constant 0 : index
    %c0_4 = arith.constant 0 : index
    %3 = vector.load %arg2[%c0_3, %c0_4] : memref<8x4xf32, #tpu.memory_space<vmem>>, vector<8x4xf32>
    %c0_5 = arith.constant 0 : index
    %c0_6 = arith.constant 0 : index
    %4 = vector.load %arg4[%c0_5, %c0_6] : memref<4x64xf32, #tpu.memory_space<vmem>>, vector<4x64xf32>
    %cst_7 = arith.constant dense<0.000000e+00> : vector<8x64xf32>
    %5 = tpu.matmul %3, %4, %cst_7 {dimension_numbers = #tpu.dot_dimension_numbers<[1], [0], [0], [1], [0, 0, 1, 1], [], []>} : vector<8x4xf32>, vector<4x64xf32>, vector<8x64xf32> -> vector<8x64xf32>
    %6 = arith.addf %2, %5 : vector<8x64xf32>
    %c0_8 = arith.constant 0 : index
    %c0_9 = arith.constant 0 : index
    %7 = vector.load %arg5[%c0_8, %c0_9] : memref<1x64xf32, #tpu.memory_space<vmem>>, vector<1x64xf32>
    %8 = vector.broadcast %7 : vector<1x64xf32> to vector<8x64xf32>
    %9 = arith.addf %6, %8 : vector<8x64xf32>
    %cst_10 = arith.constant 0.000000e+00 : f32
    %10 = vector.broadcast %cst_10 : f32 to vector<8x64xf32>
    %11 = arith.maximumf %9, %10 : vector<8x64xf32>
    %c0_11 = arith.constant 0 : index
    %c0_12 = arith.constant 0 : index
    %12 = vector.load %arg6[%c0_11, %c0_12] : memref<64x64xf32, #tpu.memory_space<vmem>>, vector<64x64xf32>
    %cst_13 = arith.constant dense<0.000000e+00> : vector<8x64xf32>
    %13 = tpu.matmul %11, %12, %cst_13 {dimension_numbers = #tpu.dot_dimension_numbers<[1], [0], [0], [1], [0, 0, 1, 1], [], []>} : vector<8x64xf32>, vector<64x64xf32>, vector<8x64xf32> -> vector<8x64xf32>
    %c0_14 = arith.constant 0 : index
    %c0_15 = arith.constant 0 : index
    %14 = vector.load %arg7[%c0_14, %c0_15] : memref<1x64xf32, #tpu.memory_space<vmem>>, vector<1x64xf32>
    %15 = vector.broadcast %14 : vector<1x64xf32> to vector<8x64xf32>
    %16 = arith.addf %13, %15 : vector<8x64xf32>
    %cst_16 = arith.constant 0.000000e+00 : f32
    %17 = vector.broadcast %cst_16 : f32 to vector<8x64xf32>
    %18 = arith.maximumf %16, %17 : vector<8x64xf32>
    %c0_17 = arith.constant 0 : index
    %c0_18 = arith.constant 0 : index
    %19 = vector.load %arg8[%c0_17, %c0_18] : memref<64x2xf32, #tpu.memory_space<vmem>>, vector<64x2xf32>
    %cst_19 = arith.constant dense<0.000000e+00> : vector<8x2xf32>
    %20 = tpu.matmul %18, %19, %cst_19 {dimension_numbers = #tpu.dot_dimension_numbers<[1], [0], [0], [1], [0, 0, 1, 1], [], []>} : vector<8x64xf32>, vector<64x2xf32>, vector<8x2xf32> -> vector<8x2xf32>
    %c0_20 = arith.constant 0 : index
    %c0_21 = arith.constant 0 : index
    %21 = vector.load %arg9[%c0_20, %c0_21] : memref<1x2xf32, #tpu.memory_space<vmem>>, vector<1x2xf32>
    %22 = vector.broadcast %21 : vector<1x2xf32> to vector<8x2xf32>
    %23 = arith.addf %20, %22 : vector<8x2xf32>
    %c0_22 = arith.constant 0 : index
    %c0_23 = arith.constant 0 : index
    %24 = vector.load %arg10[%c0_22, %c0_23] : memref<8x2xf32, #tpu.memory_space<vmem>>, vector<8x2xf32>
    tpu.vector_store %arg10[%c0_22, %c0_23], %23 {strides = array<i32>} : memref<8x2xf32, #tpu.memory_space<vmem>>, vector<8x2xf32>,
    return
  }
  func.func @transform_0(%arg0: i32) -> (i32, i32) {
    %c0_i32 = arith.constant 0 : i32
    %c0_i32_0 = arith.constant 0 : i32
    return %arg0, %c0_i32 : i32, i32
  }
  func.func @transform_1(%arg0: i32) -> (i32, i32) {
    %c0_i32 = arith.constant 0 : i32
    %c0_i32_0 = arith.constant 0 : i32
    return %arg0, %c0_i32 : i32, i32
  }
  func.func @transform_2(%arg0: i32) -> (i32, i32) {
    %c0_i32 = arith.constant 0 : i32
    %c0_i32_0 = arith.constant 0 : i32
    %c0_i32_1 = arith.constant 0 : i32
    return %c0_i32, %c0_i32_0 : i32, i32
  }
  func.func @transform_3(%arg0: i32) -> (i32, i32) {
    %c0_i32 = arith.constant 0 : i32
    %c0_i32_0 = arith.constant 0 : i32
    %c0_i32_1 = arith.constant 0 : i32
    return %c0_i32, %c0_i32_0 : i32, i32
  }
  func.func @transform_4(%arg0: i32) -> (i32, i32) {
    %c0_i32 = arith.constant 0 : i32
    %c0_i32_0 = arith.constant 0 : i32
    %c0_i32_1 = arith.constant 0 : i32
    return %c0_i32, %c0_i32_0 : i32, i32
  }
  func.func @transform_5(%arg0: i32) -> (i32, i32) {
    %c0_i32 = arith.constant 0 : i32
    %c0_i32_0 = arith.constant 0 : i32
    %c0_i32_1 = arith.constant 0 : i32
    return %c0_i32, %c0_i32_0 : i32, i32
  }
  func.func @transform_6(%arg0: i32) -> (i32, i32) {
    %c0_i32 = arith.constant 0 : i32
    %c0_i32_0 = arith.constant 0 : i32
    %c0_i32_1 = arith.constant 0 : i32
    return %c0_i32, %c0_i32_0 : i32, i32
  }
  func.func @transform_7(%arg0: i32) -> (i32, i32) {
    %c0_i32 = arith.constant 0 : i32
    %c0_i32_0 = arith.constant 0 : i32
    %c0_i32_1 = arith.constant 0 : i32
    return %c0_i32, %c0_i32_0 : i32, i32
  }
  func.func @transform_8(%arg0: i32) -> (i32, i32) {
    %c0_i32 = arith.constant 0 : i32
    %c0_i32_0 = arith.constant 0 : i32
    %c0_i32_1 = arith.constant 0 : i32
    return %c0_i32, %c0_i32_0 : i32, i32
  }
  func.func @transform_9(%arg0: i32) -> (i32, i32) {
    %c0_i32 = arith.constant 0 : i32
    %c0_i32_0 = arith.constant 0 : i32
    return %arg0, %c0_i32 : i32, i32
  }
}

</mosaic_0001>

<bundles_post_ra>
// kernel: critic_forward.1
= control target key start
LH: loop header
LB: loop body
LE: loop exit
PB: predicated region body
PF: predicated region fallthrough
CT: control target
= control target key end

     0   :  { %vm41_vm0 = vcmask 1043456   ;;  %v499_v0 = vmov 0.0|0.0   ;;  %v500_v1 = vmov 0.0   ;;  %vm501_vm1 = vmmov 1   ;;  %s634_s2 = inlined_call_operand.vmem [shape: f32[12,64], index: 2, kind: input, shape index: {}]   ;;  %s635_s3 = inlined_call_operand.vmem [shape: f32[4,64], index: 3, kind: input, shape index: {}]   ;;  %s636_s1 = inlined_call_operand.vmem [shape: f32[8,4], index: 1, kind: input, shape index: {}]   ;;  %s637_s5 = inlined_call_operand.vmem [shape: f32[64,64], index: 5, kind: input, shape index: {}]   ;;  %s638_s0 = inlined_call_operand.vmem [shape: f32[8,12], index: 0, kind: input, shape index: {}]   ;;  %s639_s7 = inlined_call_operand.vmem [shape: f32[64,2], index: 7, kind: input, shape index: {}]   ;;  %s640_s4 = inlined_call_operand.vmem [shape: f32[1,64], index: 4, kind: input, shape index: {}]   ;;  %s641_s6 = inlined_call_operand.vmem [shape: f32[1,64], index: 6, kind: input, shape index: {}]   ;;  %s642_s8 = inlined_call_operand.vmem [shape: f32[1,2], index: 8, kind: input, shape index: {}]   ;;  %s643_s9 = inlined_call_operand.vmem [shape: f32[8,2], index: 9, kind: output, shape index: {}]  }
   0x1   :  { %467 = vmatprep.subr.bf16.mxu1 %v499_v0  ;;  %417 = vmatprep.subr.mxu0 %v500_v1  ;;  %v33_v2 = vld [vmem:[%s634_s2] sm:$0xff]  ;;  %v34_v3 = vld [vmem:[%s634_s2 + $0x8] sm:$0xf]  ;;  %vm469_vm2 = vmpackc.low %vm41_vm0, %vm501_vm1  ;;  %vm37_vm3 = vcmask 31744   ;;  %vm502_vm4 = vmmov 0   ;;  %vm115_vm5 = vcmask 97280  }
   0x2   :  { %v468_v4 = vpack.c.bf16 %v34_v3, %v33_v2  ;;  %v36_v5 = vld [vmem:[%s635_s3] sm:$0xf]  ;;  %419 = vmatprep.mubr.msk.f32.mxu0 %vm502_vm4, %v500_v1  ;;  %426 = vmatprep.mubr.msk.f32.mxu1 %vm502_vm4, %v500_v1  ;;  %v202_v8 = vld [vmem:[%s637_s5 + $0x8] sm:$0xff]  ;;  %v203_v9 = vld [vmem:[%s637_s5 + $0x10] sm:$0xff]  ;;  %vm216_vm6 = vcmask 523264   ;;  %vm379_vm7 = vcmask 15360  }
   0x3   :  { %v35_v6 = vld [vmem:[%s636_s1] sm:$0xff]  ;;  %418 = vmatpush3.msk.msra.mxu0 %vm41_vm0, %v36_v5  ;;  %v204_v12 = vld [vmem:[%s637_s5 + $0x18] sm:$0xff]  ;;  %v206_v15 = vld [vmem:[%s637_s5 + $0x28] sm:$0xff] }
   0x4   :  { %v201_v7 = vld [vmem:[%s637_s5] sm:$0xff]  ;;  %470 = vmatpush3.bf16.msk.msra.mxu1 %vm469_vm2, %v468_v4  ;;  %420 = vmatmul.mubr.msk.f32.vlgmr.msra.gmra.mrb[0].mxu0 %vm37_vm3, %v35_v6  ;;  %v475_v13 = vpack.c.bf16 %v204_v12, %v203_v9  ;;  %v207_v17 = vld [vmem:[%s637_s5 + $0x30] sm:$0xff]  ;;  %v208_v18 = vld [vmem:[%s637_s5 + $0x38] sm:$0xff] }
   0x5   :  { %v32_v10 = vld [vmem:[%s638_s0] sm:$0xff]  ;;  %v472_v11 = vpack.c.bf16 %v202_v8, %v201_v7  ;;  %471 = vmatprep.subr.bf16.mxu0 %v499_v0  ;;  %445 = vmatprep.mubr.msk.f32.mxu0 %vm502_vm4, %v500_v1  ;;  %v481_v19 = vpack.c.bf16 %v208_v18, %v207_v17  ;;  %v292_v21 = vld [vmem:[%s639_s7 + $0x8] sm:$0xff]  ;;  %v293_v22 = vld [vmem:[%s639_s7 + $0x10] sm:$0xff] }
   0x6   :  { %483 = vmatprep.subr.bf16.mxu1 %v499_v0  ;;  %v205_v14 = vld [vmem:[%s637_s5 + $0x20] sm:$0xff]  ;;  %v294_v24 = vld [vmem:[%s639_s7 + $0x18] sm:$0xff]  ;;  %v296_v27 = vld [vmem:[%s639_s7 + $0x28] sm:$0xff] }
   0x7   :  { %473 = vmatpush3.bf16.msra.mxu0 %v472_v11  ;;  %427 = vmatmul.mubr.msk.f32.vlgmr.msra.gmra.mrb[0].mxu1 %vm115_vm5, %v32_v10  ;;  %v478_v16 = vpack.c.bf16 %v206_v15, %v205_v14  ;;  %v291_v20 = vld [vmem:[%s639_s7] sm:$0xff]  ;;  %v487_v25 = vpack.c.bf16 %v294_v24, %v293_v22  ;;  %v297_v37 = vld [vmem:[%s639_s7 + $0x30] sm:$0xff]  ;;  %v298_v38 = vld [vmem:[%s639_s7 + $0x38] sm:$0xff] }
   0x8   :  { %474 = vmatprep.subr.bf16.mxu0 %v499_v0  ;;  %464 = vmatprep.mubr.msk.f32.mxu1 %vm502_vm4, %v500_v1  ;;  %v484_v23 = vpack.c.bf16 %v292_v21, %v291_v20  ;;  %v295_v26 = vld [vmem:[%s639_s7 + $0x20] sm:$0xff]  ;;  %v493_v39 = vpack.c.bf16 %v298_v38, %v297_v37 }
   0x9   :  { %v490_v28 = vpack.c.bf16 %v296_v27, %v295_v26  ;;  %v389_v32 = vld [vmem:[%s640_s4] ss:$0 sm:$0xff] }
   0xa   :  { %485 = vmatpush3.bf16.msra.mxu1 %v484_v23  ;;  %v390_v40 = vld [vmem:[%s641_s6] ss:$0 sm:$0xff] }
   0xb   :  { %476 = vmatpush3.bf16.msra.mxu0 %v475_v13  ;;  %486 = vmatprep.subr.bf16.mxu1 %v499_v0  ;;  %v392_v45 = vld [vmem:[%s642_s8] ss:$0 sm:$0xff] }
   0xc   :  { %477 = vmatprep.subr.bf16.mxu0 %v499_v0 }
   0xe   :  { %488 = vmatpush3.bf16.msra.mxu1 %v487_v25 }
   0xf   :  { %479 = vmatpush3.bf16.msra.mxu0 %v478_v16  ;;  %489 = vmatprep.subr.bf16.mxu1 %v499_v0 }
  0x10   :  { %480 = vmatprep.subr.bf16.mxu0 %v499_v0 }
  0x12   :  { %491 = vmatpush3.bf16.msra.mxu1 %v490_v28 }
  0x13   :  { %482 = vmatpush3.bf16.msra.mxu0 %v481_v19  ;;  %492 = vmatprep.subr.bf16.mxu1 %v499_v0 }
  0x16   :  { %494 = vmatpush3.bf16.msra.mxu1 %v493_v39 }
  0xd7   :  { %v111_v29 = vpop.f32.mrb[0].mxu0 }
  0xd8   :  { %v421_v30 = vpop.f32.mrb[1].mxu0 }
  0xda   :  { %v188_v31 = vpop.f32.mrb[0].mxu1 }
  0xdb   :  { %v189_v33 = vadd.f32 %v188_v31, %v111_v29  ;;  %v428_v34 = vpop.f32.mrb[1].mxu1 }
  0xdd   :  { %v199_v35 = vadd.f32 %v389_v32, %v189_v33 }
  0xdf   :  { %v200_v36 = vmax.f32 %v199_v35, 0.0 }
  0xe1   :  { %446 = vmatmul.mubr.msk.f32.vlgmr.msra.gmra.mrb[2].mxu0 %vm216_vm6, %v200_v36 }
 0x1b4   :  { %v286_v41 = vpop.f32.mrb[2].mxu0 }
 0x1b5   :  { %v287_v42 = vadd.f32 %v390_v40, %v286_v41  ;;  %v447_v43 = vpop.f32.mrb[3].mxu0 }
 0x1b7   :  { %v290_v44 = vmax.f32 %v287_v42, 0.0 }
 0x1b9   :  { %465 = vmatmul.mubr.msk.f32.vlgmr.msra.gmra.mrb[2].mxu1 %vm216_vm6, %v290_v44 }
 0x28c   :  { %v375_v46 = vpop.f32.mrb[2].mxu1 }
 0x28d   :  { %v376_v47 = vadd.f32 %v392_v45, %v375_v46  ;;  %v466_v48 = vpop.f32.mrb[3].mxu1 }
 0x28f   :  { %380 = vst.msk [vmem:[%s643_s9] sm:$0xff] %vm379_vm7, %v376_v47 }

</bundles_post_ra>
